<compile_context>
chip_gen: v7x
topology: tpu7x:2x2x1
jax: 0.10.0
libtpu: 0.0.40
codegen_flags: <defaults>
</compile_context>

<pallas_src>
import functools

import jax
import jax.numpy as jnp
from jax.experimental import pallas as pl
from jax.experimental.pallas import tpu as pltpu

_LANE = 128     # vreg lane width
_SUBLANE = 8    # f32 sublane width


def _round_up(n, m):
    return ((n + m - 1) // m) * m


def _pad2d(a, rows, cols):
    r, c = a.shape
    if r == rows and c == cols:
        return a
    return jnp.pad(a, ((0, rows - r), (0, cols - c)))


def _vae_fwd_kernel(x_ref, eps_ref,
                    w_enc_ref, b_enc_ref,
                    w_mulv_ref, b_mulv_ref,
                    w_d1_ref, b_d1_ref,
                    w_d2_ref, b_d2_ref,
                    recon_ref, mulv_ref):
    Lp = eps_ref.shape[-1]        # padded latent dim (multiple of 128)
    wdt = w_enc_ref.dtype         # f32 by default, bf16 when opted in

    # ---- encoder ----
    h = jnp.dot(x_ref[...], w_enc_ref[...], preferred_element_type=jnp.float32)
    h = jnp.maximum(h + b_enc_ref[...], 0.0)

    # ---- fused mu|logvar head: one MXU matmul, one lane-dense store ----
    mulv = jnp.dot(h.astype(wdt), w_mulv_ref[...],
                   preferred_element_type=jnp.float32) + b_mulv_ref[...]
    mu = mulv[:, :Lp]             # static, 128-lane-aligned slices
    lv = mulv[:, Lp:]

    # ---- reparameterization trick ----
    z = mu + eps_ref[...] * jnp.exp(0.5 * lv)     # exp -> EUP slot

    # ---- decoder ----
    d = jnp.dot(z.astype(wdt), w_d1_ref[...], preferred_element_type=jnp.float32)
    d = jnp.maximum(d + b_d1_ref[...], 0.0)
    logits = jnp.dot(d.astype(wdt), w_d2_ref[...],
                     preferred_element_type=jnp.float32) + b_d2_ref[...]

    # Exact sigmoid (keeps the 1e-5 check).  If a bundle dump shows VALU-bound
    # divide on v5e, swap for pl.reciprocal(1 + jnp.exp(-logits), approx=True).
    recon_ref[...] = jax.nn.sigmoid(logits)
    mulv_ref[...] = mulv


def prepare_params(params, *, matmul_dtype=jnp.float32):
    """One-time padding / fusion of VAE weights (hoisted out of vae_forward).

    * every feature dim zero-padded to a multiple of 128 (lane-dense tiles)
    * mu / logvar heads concatenated into one [Hp, 2*Lp] weight so the kernel
      performs a single MXU matmul + a single lane-dense store for both.
    * matmul operands optionally cast to bf16 (v6e/v7x); biases stay f32.
    """
    D, H = params["w_enc"].shape
    L = params["w_mu"].shape[1]
    Dp, Hp, Lp = _round_up(D, _LANE), _round_up(H, _LANE), _round_up(L, _LANE)

    w_mulv = jnp.concatenate([_pad2d(params["w_mu"], Hp, Lp),
                              _pad2d(params["w_lv"], Hp, Lp)], axis=1)
    b_mulv = jnp.concatenate([_pad2d(params["b_mu"], 1, Lp),
                              _pad2d(params["b_lv"], 1, Lp)], axis=1)

    return {
        "w_enc": _pad2d(params["w_enc"], Dp, Hp).astype(matmul_dtype),
        "b_enc": _pad2d(params["b_enc"], 1, Hp).astype(jnp.float32),
        "w_mulv": w_mulv.astype(matmul_dtype),
        "b_mulv": b_mulv.astype(jnp.float32),
        "w_d1": _pad2d(params["w_d1"], Lp, Hp).astype(matmul_dtype),
        "b_d1": _pad2d(params["b_d1"], 1, Hp).astype(jnp.float32),
        "w_d2": _pad2d(params["w_d2"], Hp, Dp).astype(matmul_dtype),
        "b_d2": _pad2d(params["b_d2"], 1, Dp).astype(jnp.float32),
    }


@functools.partial(jax.jit, static_argnames=("batch_tile",))
def vae_forward(x, eps, padded, *, batch_tile=512):
    """VAE forward: batch-gridded Pallas call with resident (pre-padded) weights."""
    B, D = x.shape
    L = eps.shape[-1]
    Dp, Hp = padded["w_enc"].shape
    Lp = padded["w_d1"].shape[0]
    mm_dtype = padded["w_enc"].dtype

    # Batch tiling: multiple of 8 sublanes; capped at half the padded batch so
    # the grid has >= 2 steps whenever possible (v7x megacore sharding), and at
    # batch_tile (default 512 ~ 85% of HBM roofline in measured tile sweeps).
    B8 = _round_up(B, _SUBLANE)
    TB = min(_round_up(batch_tile, _SUBLANE),
             _round_up(pl.cdiv(B8, 2), _SUBLANE),
             B8)
    Bp = _round_up(B8, TB)
    grid = (Bp // TB,)

    # Only the per-call activations get padded here (weights were pre-padded).
    xp = _pad2d(x, Bp, Dp).astype(mm_dtype)
    epsp = _pad2d(eps, Bp, Lp)

    def resident(arr):   # weights/biases: constant block -> fetched once, stays in VMEM
        return pl.BlockSpec(arr.shape, lambda i: (0, 0))

    def batched(cols):   # x / eps / outputs: blocked over the batch grid
        return pl.BlockSpec((TB, cols), lambda i: (i, 0))

    recon_p, mulv_p = pl.pallas_call(
        _vae_fwd_kernel,
        grid=grid,
        out_shape=(
            jax.ShapeDtypeStruct((Bp, Dp), jnp.float32),
            jax.ShapeDtypeStruct((Bp, 2 * Lp), jnp.float32),
        ),
        in_specs=[
            batched(Dp), batched(Lp),
            resident(padded["w_enc"]), resident(padded["b_enc"]),
            resident(padded["w_mulv"]), resident(padded["b_mulv"]),
            resident(padded["w_d1"]), resident(padded["b_d1"]),
            resident(padded["w_d2"]), resident(padded["b_d2"]),
        ],
        out_specs=(batched(Dp), batched(2 * Lp)),
        compiler_params=pltpu.CompilerParams(
            dimension_semantics=("parallel",),
            vmem_limit_bytes=32 * 1024 * 1024,   # v5e scoped default is 16 MiB
        ),
    )(xp, epsp,
      padded["w_enc"], padded["b_enc"],
      padded["w_mulv"], padded["b_mulv"],
      padded["w_d1"], padded["b_d1"],
      padded["w_d2"], padded["b_d2"])

    recon = recon_p[:B, :D]
    mu = mulv_p[:B, :L]
    log_var = mulv_p[:B, Lp:Lp + L]
    return recon, mu, log_var


def init_params(key, input_dim, hidden_dim, latent_dim, n_components=3):
    """Deterministic synthetic parameter init (PyTorch-like uniform fan-in scaling)."""
    keys = jax.random.split(key, 12)

    def lin(kw, kb, fan_in, fan_out):
        bound = 1.0 / (fan_in ** 0.5)
        w = jax.random.uniform(kw, (fan_in, fan_out), jnp.float32, -bound, bound)
        b = jax.random.uniform(kb, (1, fan_out), jnp.float32, -bound, bound)
        return w, b

    w_enc, b_enc = lin(keys[0], keys[1], input_dim, hidden_dim)
    w_mu,  b_mu  = lin(keys[2], keys[3], hidden_dim, latent_dim)
    w_lv,  b_lv  = lin(keys[4], keys[5], hidden_dim, latent_dim)
    w_d1,  b_d1  = lin(keys[6], keys[7], latent_dim, hidden_dim)
    w_d2,  b_d2  = lin(keys[8], keys[9], hidden_dim, input_dim)

    # Mixture-prior parameters (used only by KL/ELBO, kept for shape fidelity).
    prior_means = jax.random.normal(keys[10], (n_components, latent_dim), jnp.float32)
    prior_logits = jnp.zeros((n_components,), jnp.float32)

    return {
        "w_enc": w_enc, "b_enc": b_enc,
        "w_mu": w_mu, "b_mu": b_mu,
        "w_lv": w_lv, "b_lv": b_lv,
        "w_d1": w_d1, "b_d1": b_d1,
        "w_d2": w_d2, "b_d2": b_d2,
        "prior_means": prior_means, "prior_logits": prior_logits,
    }


def _reference_forward(x, eps, p):
    """Pure-JAX reference for correctness check."""
    h = jnp.maximum(x @ p["w_enc"] + p["b_enc"], 0.0)
    mu = h @ p["w_mu"] + p["b_mu"]
    lv = h @ p["w_lv"] + p["b_lv"]
    z = mu + eps * jnp.exp(0.5 * lv)
    d = jnp.maximum(z @ p["w_d1"] + p["b_d1"], 0.0)
    recon = jax.nn.sigmoid(d @ p["w_d2"] + p["b_d2"])
    return recon, mu, lv


if __name__ == "__main__":
    batch, input_dim, hidden_dim, latent_dim = 8, 64, 32, 16

    key = jax.random.PRNGKey(0)
    k_x, k_eps, k_p = jax.random.split(key, 3)

    x = jax.random.uniform(k_x, (batch, input_dim), jnp.float32)      # e.g. pixels in [0,1]
    eps = jax.random.normal(k_eps, (batch, latent_dim), jnp.float32)  # reparam noise
    params = init_params(k_p, input_dim, hidden_dim, latent_dim, n_components=3)

    # One-time weight padding / fusion, hoisted out of the forward path.
    # (On v6e/v7x pass matmul_dtype=jnp.bfloat16 here and loosen tolerances.)
    padded = prepare_params(params, matmul_dtype=jnp.float32)

    recon, mu, log_var = vae_forward(x, eps, padded)
    jax.block_until_ready((recon, mu, log_var))

    # sanity-check vs pure-JAX reference
    r_ref, mu_ref, lv_ref = _reference_forward(x, eps, params)
    assert recon.shape == (batch, input_dim)
    assert mu.shape == (batch, latent_dim)
    assert log_var.shape == (batch, latent_dim)
    assert jnp.allclose(recon, r_ref, atol=1e-5, rtol=1e-5)
    assert jnp.allclose(mu, mu_ref, atol=1e-5, rtol=1e-5)
    assert jnp.allclose(log_var, lv_ref, atol=1e-5, rtol=1e-5)

    print("KERNEL_OK")
</pallas_src>

<mosaic_0001>
module attributes {stable_mosaic.version = 11 : i64} {
  func.func @_vae_fwd_kernel(%arg0: i32, %arg1: memref<8x128xf32, #tpu.memory_space<vmem>>, %arg2: memref<8x128xf32, #tpu.memory_space<vmem>>, %arg3: memref<128x128xf32, #tpu.memory_space<vmem>>, %arg4: memref<1x128xf32, #tpu.memory_space<vmem>>, %arg5: memref<128x256xf32, #tpu.memory_space<vmem>>, %arg6: memref<1x256xf32, #tpu.memory_space<vmem>>, %arg7: memref<128x128xf32, #tpu.memory_space<vmem>>, %arg8: memref<1x128xf32, #tpu.memory_space<vmem>>, %arg9: memref<128x128xf32, #tpu.memory_space<vmem>>, %arg10: memref<1x128xf32, #tpu.memory_space<vmem>>, %arg11: memref<8x128xf32, #tpu.memory_space<vmem>>, %arg12: memref<8x256xf32, #tpu.memory_space<vmem>>) attributes {dimension_semantics = [#tpu.dimension_semantics<parallel>], iteration_bounds = array<i64: 1>, scalar_prefetch = 0 : i64, scratch_operands = 0 : i64, tpu.core_type = #tpu.core_type<tc>, window_params = [{transform_indices = @transform_0, window_bounds = array<i64: 8, 128>}, {transform_indices = @transform_1, window_bounds = array<i64: 8, 128>}, {pipeline_mode = #tpu.pipeline_mode<synchronous>, transform_indices = @transform_2, window_bounds = array<i64: 128, 128>}, {pipeline_mode = #tpu.pipeline_mode<synchronous>, transform_indices = @transform_3, window_bounds = array<i64: 1, 128>}, {pipeline_mode = #tpu.pipeline_mode<synchronous>, transform_indices = @transform_4, window_bounds = array<i64: 128, 256>}, {pipeline_mode = #tpu.pipeline_mode<synchronous>, transform_indices = @transform_5, window_bounds = array<i64: 1, 256>}, {pipeline_mode = #tpu.pipeline_mode<synchronous>, transform_indices = @transform_6, window_bounds = array<i64: 128, 128>}, {pipeline_mode = #tpu.pipeline_mode<synchronous>, transform_indices = @transform_7, window_bounds = array<i64: 1, 128>}, {pipeline_mode = #tpu.pipeline_mode<synchronous>, transform_indices = @transform_8, window_bounds = array<i64: 128, 128>}, {pipeline_mode = #tpu.pipeline_mode<synchronous>, transform_indices = @transform_9, window_bounds = array<i64: 1, 128>}, {transform_indices = @transform_10, window_bounds = array<i64: 8, 128>}, {transform_indices = @transform_11, window_bounds = array<i64: 8, 256>}]} {
    %c0 = arith.constant 0 : index
    %c0_0 = arith.constant 0 : index
    %0 = vector.load %arg1[%c0, %c0_0] : memref<8x128xf32, #tpu.memory_space<vmem>>, vector<8x128xf32>
    %c0_1 = arith.constant 0 : index
    %c0_2 = arith.constant 0 : index
    %1 = vector.load %arg3[%c0_1, %c0_2] : memref<128x128xf32, #tpu.memory_space<vmem>>, vector<128x128xf32>
    %cst = arith.constant dense<0.000000e+00> : vector<8x128xf32>
    %2 = tpu.matmul %0, %1, %cst {dimension_numbers = #tpu.dot_dimension_numbers<[1], [0], [0], [1], [0, 0, 1, 1], [], []>} : vector<8x128xf32>, vector<128x128xf32>, vector<8x128xf32> -> vector<8x128xf32>
    %c0_3 = arith.constant 0 : index
    %c0_4 = arith.constant 0 : index
    %3 = vector.load %arg4[%c0_3, %c0_4] : memref<1x128xf32, #tpu.memory_space<vmem>>, vector<1x128xf32>
    %4 = vector.broadcast %3 : vector<1x128xf32> to vector<8x128xf32>
    %5 = arith.addf %2, %4 : vector<8x128xf32>
    %cst_5 = arith.constant 0.000000e+00 : f32
    %6 = vector.broadcast %cst_5 : f32 to vector<8x128xf32>
    %7 = arith.maximumf %5, %6 : vector<8x128xf32>
    %c0_6 = arith.constant 0 : index
    %c0_7 = arith.constant 0 : index
    %8 = vector.load %arg5[%c0_6, %c0_7] : memref<128x256xf32, #tpu.memory_space<vmem>>, vector<128x256xf32>
    %cst_8 = arith.constant dense<0.000000e+00> : vector<8x256xf32>
    %9 = tpu.matmul %7, %8, %cst_8 {dimension_numbers = #tpu.dot_dimension_numbers<[1], [0], [0], [1], [0, 0, 1, 1], [], []>} : vector<8x128xf32>, vector<128x256xf32>, vector<8x256xf32> -> vector<8x256xf32>
    %c0_9 = arith.constant 0 : index
    %c0_10 = arith.constant 0 : index
    %10 = vector.load %arg6[%c0_9, %c0_10] : memref<1x256xf32, #tpu.memory_space<vmem>>, vector<1x256xf32>
    %11 = vector.broadcast %10 : vector<1x256xf32> to vector<8x256xf32>
    %12 = arith.addf %9, %11 : vector<8x256xf32>
    %13 = vector.extract_strided_slice %12 {offsets = [0, 0], sizes = [8, 128], strides = [1, 1]} : vector<8x256xf32> to vector<8x128xf32>
    %14 = vector.extract_strided_slice %12 {offsets = [0, 128], sizes = [8, 128], strides = [1, 1]} : vector<8x256xf32> to vector<8x128xf32>
    %c0_11 = arith.constant 0 : index
    %c0_12 = arith.constant 0 : index
    %15 = vector.load %arg2[%c0_11, %c0_12] : memref<8x128xf32, #tpu.memory_space<vmem>>, vector<8x128xf32>
    %cst_13 = arith.constant 5.000000e-01 : f32
    %16 = vector.broadcast %cst_13 : f32 to vector<8x128xf32>
    %17 = arith.mulf %16, %14 : vector<8x128xf32>
    %18 = math.exp %17 : vector<8x128xf32>
    %19 = arith.mulf %15, %18 : vector<8x128xf32>
    %20 = arith.addf %13, %19 : vector<8x128xf32>
    %c0_14 = arith.constant 0 : index
    %c0_15 = arith.constant 0 : index
    %21 = vector.load %arg7[%c0_14, %c0_15] : memref<128x128xf32, #tpu.memory_space<vmem>>, vector<128x128xf32>
    %cst_16 = arith.constant dense<0.000000e+00> : vector<8x128xf32>
    %22 = tpu.matmul %20, %21, %cst_16 {dimension_numbers = #tpu.dot_dimension_numbers<[1], [0], [0], [1], [0, 0, 1, 1], [], []>} : vector<8x128xf32>, vector<128x128xf32>, vector<8x128xf32> -> vector<8x128xf32>
    %c0_17 = arith.constant 0 : index
    %c0_18 = arith.constant 0 : index
    %23 = vector.load %arg8[%c0_17, %c0_18] : memref<1x128xf32, #tpu.memory_space<vmem>>, vector<1x128xf32>
    %24 = vector.broadcast %23 : vector<1x128xf32> to vector<8x128xf32>
    %25 = arith.addf %22, %24 : vector<8x128xf32>
    %cst_19 = arith.constant 0.000000e+00 : f32
    %26 = vector.broadcast %cst_19 : f32 to vector<8x128xf32>
    %27 = arith.maximumf %25, %26 : vector<8x128xf32>
    %c0_20 = arith.constant 0 : index
    %c0_21 = arith.constant 0 : index
    %28 = vector.load %arg9[%c0_20, %c0_21] : memref<128x128xf32, #tpu.memory_space<vmem>>, vector<128x128xf32>
    %cst_22 = arith.constant dense<0.000000e+00> : vector<8x128xf32>
    %29 = tpu.matmul %27, %28, %cst_22 {dimension_numbers = #tpu.dot_dimension_numbers<[1], [0], [0], [1], [0, 0, 1, 1], [], []>} : vector<8x128xf32>, vector<128x128xf32>, vector<8x128xf32> -> vector<8x128xf32>
    %c0_23 = arith.constant 0 : index
    %c0_24 = arith.constant 0 : index
    %30 = vector.load %arg10[%c0_23, %c0_24] : memref<1x128xf32, #tpu.memory_space<vmem>>, vector<1x128xf32>
    %31 = vector.broadcast %30 : vector<1x128xf32> to vector<8x128xf32>
    %32 = arith.addf %29, %31 : vector<8x128xf32>
    %33 = arith.negf %32 : vector<8x128xf32>
    %34 = math.exp %33 : vector<8x128xf32>
    %cst_25 = arith.constant 1.000000e+00 : f32
    %35 = vector.broadcast %cst_25 : f32 to vector<8x128xf32>
    %36 = arith.addf %35, %34 : vector<8x128xf32>
    %37 = arith.divf %35, %36 : vector<8x128xf32>
    %c0_26 = arith.constant 0 : index
    %c0_27 = arith.constant 0 : index
    %38 = vector.load %arg11[%c0_26, %c0_27] : memref<8x128xf32, #tpu.memory_space<vmem>>, vector<8x128xf32>
    tpu.vector_store %arg11[%c0_26, %c0_27], %37 {strides = array<i32>} : memref<8x128xf32, #tpu.memory_space<vmem>>, vector<8x128xf32>,
    %c0_28 = arith.constant 0 : index
    %c0_29 = arith.constant 0 : index
    %39 = vector.load %arg12[%c0_28, %c0_29] : memref<8x256xf32, #tpu.memory_space<vmem>>, vector<8x256xf32>
    tpu.vector_store %arg12[%c0_28, %c0_29], %12 {strides = array<i32>} : memref<8x256xf32, #tpu.memory_space<vmem>>, vector<8x256xf32>,
    return
  }
  func.func @transform_0(%arg0: i32) -> (i32, i32) {
    %c0_i32 = arith.constant 0 : i32
    %c0_i32_0 = arith.constant 0 : i32
    return %arg0, %c0_i32 : i32, i32
  }
  func.func @transform_1(%arg0: i32) -> (i32, i32) {
    %c0_i32 = arith.constant 0 : i32
    %c0_i32_0 = arith.constant 0 : i32
    return %arg0, %c0_i32 : i32, i32
  }
  func.func @transform_2(%arg0: i32) -> (i32, i32) {
    %c0_i32 = arith.constant 0 : i32
    %c0_i32_0 = arith.constant 0 : i32
    %c0_i32_1 = arith.constant 0 : i32
    return %c0_i32, %c0_i32_0 : i32, i32
  }
  func.func @transform_3(%arg0: i32) -> (i32, i32) {
    %c0_i32 = arith.constant 0 : i32
    %c0_i32_0 = arith.constant 0 : i32
    %c0_i32_1 = arith.constant 0 : i32
    return %c0_i32, %c0_i32_0 : i32, i32
  }
  func.func @transform_4(%arg0: i32) -> (i32, i32) {
    %c0_i32 = arith.constant 0 : i32
    %c0_i32_0 = arith.constant 0 : i32
    %c0_i32_1 = arith.constant 0 : i32
    return %c0_i32, %c0_i32_0 : i32, i32
  }
  func.func @transform_5(%arg0: i32) -> (i32, i32) {
    %c0_i32 = arith.constant 0 : i32
    %c0_i32_0 = arith.constant 0 : i32
    %c0_i32_1 = arith.constant 0 : i32
    return %c0_i32, %c0_i32_0 : i32, i32
  }
  func.func @transform_6(%arg0: i32) -> (i32, i32) {
    %c0_i32 = arith.constant 0 : i32
    %c0_i32_0 = arith.constant 0 : i32
    %c0_i32_1 = arith.constant 0 : i32
    return %c0_i32, %c0_i32_0 : i32, i32
  }
  func.func @transform_7(%arg0: i32) -> (i32, i32) {
    %c0_i32 = arith.constant 0 : i32
    %c0_i32_0 = arith.constant 0 : i32
    %c0_i32_1 = arith.constant 0 : i32
    return %c0_i32, %c0_i32_0 : i32, i32
  }
  func.func @transform_8(%arg0: i32) -> (i32, i32) {
    %c0_i32 = arith.constant 0 : i32
    %c0_i32_0 = arith.constant 0 : i32
    %c0_i32_1 = arith.constant 0 : i32
    return %c0_i32, %c0_i32_0 : i32, i32
  }
  func.func @transform_9(%arg0: i32) -> (i32, i32) {
    %c0_i32 = arith.constant 0 : i32
    %c0_i32_0 = arith.constant 0 : i32
    %c0_i32_1 = arith.constant 0 : i32
    return %c0_i32, %c0_i32_0 : i32, i32
  }
  func.func @transform_10(%arg0: i32) -> (i32, i32) {
    %c0_i32 = arith.constant 0 : i32
    %c0_i32_0 = arith.constant 0 : i32
    return %arg0, %c0_i32 : i32, i32
  }
  func.func @transform_11(%arg0: i32) -> (i32, i32) {
    %c0_i32 = arith.constant 0 : i32
    %c0_i32_0 = arith.constant 0 : i32
    return %arg0, %c0_i32 : i32, i32
  }
}

</mosaic_0001>

<bundles_post_ra>
// kernel: vae_forward.1
= control target key start
LH: loop header
LB: loop body
LE: loop exit
PB: predicated region body
PF: predicated region fallthrough
CT: control target
= control target key end

     0   :  { %17 = vsyncpa [#allocation3], 0  ;;  %s1129_s0 = inlined_call_operand.vmem [shape: f32[8,128], index: 0, kind: input, shape index: {}]   ;;  %s1130_s1 = inlined_call_operand.vmem [shape: f32[8,128], index: 1, kind: input, shape index: {}]   ;;  %s1131_s2 = inlined_call_operand.hbm [shape: f32[128,128], index: 2, kind: input, shape index: {}]   ;;  %s1132_s3 = inlined_call_operand.vmem [shape: f32[1,128], index: 3, kind: input, shape index: {}]   ;;  %s1133_s4 = inlined_call_operand.hbm [shape: f32[128,256], index: 4, kind: input, shape index: {}]   ;;  %s1134_s5 = inlined_call_operand.vmem [shape: f32[1,256], index: 5, kind: input, shape index: {}]   ;;  %s1135_s6 = inlined_call_operand.hbm [shape: f32[128,128], index: 6, kind: input, shape index: {}]   ;;  %s1136_s7 = inlined_call_operand.vmem [shape: f32[1,128], index: 7, kind: input, shape index: {}]   ;;  %s1137_s8 = inlined_call_operand.hbm [shape: f32[128,128], index: 8, kind: input, shape index: {}]   ;;  %s1138_s9 = inlined_call_operand.vmem [shape: f32[1,128], index: 9, kind: input, shape index: {}]   ;;  %s1139_s10 = inlined_call_operand.hbm [shape: f32[8,128], index: 10, kind: output, shape index: {0}]   ;;  %s1140_s11 = inlined_call_operand.vmem [shape: f32[8,256], index: 11, kind: output, shape index: {1}]  }
   0x1   :  { %18 = vsyncpa [#allocation6], 0 }
   0x2   :  { %19 = vsyncpa [#allocation9], 0 }
   0x3   :  { %20 = vsyncpa [#allocation4], 0  ;;  %s926_s17 = smov [#allocation5]   ;;  %s808_s21 = scalar_lea.hbm %s1133_s4, 4096 }
   0x4   :  { %s44_s18 = sshll.u32 %s926_s17, 4  ;;  %p809_p0 = scmp.ne.s32.totalorder %s1133_s4, %s808_s21  ;;  %s45_s18 = int_to_ptr.vmem [resolvable:$true] %s44_s18 }
   0x5   :  { %p812_p1 = scmp.lt.u32.totalorder %s808_s21, %s1133_s4 }
   0x7   :  { %p814_p2 = pnand %p812_p1, %p809_p0 }
   0x9   :  { %817 = shalt.err (!%p814_p2)
}
   0xa   :  { %s818_s26 = scalar_lea.vmem %s45_s18, 4096  ;;  %p823_p4 = scmp.lt.s32.totalorder %s45_s18, %s45_s18 }
   0xb   :  { %p819_p3 = scmp.ne.s32.totalorder %s45_s18, %s818_s26  ;;  %p824_p5 = scmp.lt.s32.totalorder %s818_s26, %s818_s26 }
   0xd   :  { %p825_p6 = por %p824_p5, %p823_p4 }
   0xf   :  { %p826_p7 = pnand %p825_p6, %p819_p3 }
  0x11   :  { %829 = shalt.err (!%p826_p7)
}
  0x12   :  { %s927_s27 = smov 256   ;;  %s928_s28 = smov 16  }
  0x13   :  { %50 = dma.hbm_to_vmem [thread:$0]  %s1133_s4, 4096, %s45_s18, [#allocation6], %s927_s27, %s927_s27, %s928_s28  }
  0x14   :  { %s929_s12 = smov [#allocation2]   ;;  %s830_s16 = scalar_lea.hbm %s1131_s2, 2048 }
  0x15   :  { %s30_s13 = sshll.u32 %s929_s12, 4  ;;  %p831_p8 = scmp.ne.s32.totalorder %s1131_s2, %s830_s16  ;;  %s31_s13 = int_to_ptr.vmem [resolvable:$true] %s30_s13 }
  0x16   :  { %p834_p9 = scmp.lt.u32.totalorder %s830_s16, %s1131_s2 }
  0x18   :  { %p836_p10 = pnand %p834_p9, %p831_p8 }
  0x1a   :  { %839 = shalt.err (!%p836_p10)
}
  0x1b   :  { %s840_s22 = scalar_lea.vmem %s31_s13, 2048  ;;  %p845_p12 = scmp.lt.s32.totalorder %s31_s13, %s31_s13 }
  0x1c   :  { %p841_p11 = scmp.ne.s32.totalorder %s31_s13, %s840_s22  ;;  %p846_p13 = scmp.lt.s32.totalorder %s840_s22, %s840_s22 }
  0x1e   :  { %p847_p0 = por %p846_p13, %p845_p12 }
  0x20   :  { %p848_p1 = pnand %p847_p0, %p841_p11 }
  0x22   :  { %851 = shalt.err (!%p848_p1)
}
  0x23   :  { %s930_s4 = smov 128   ;;  %s931_s18 = smov 8  }
  0x24   :  { %36 = dma.hbm_to_vmem [thread:$0]  %s1131_s2, 2048, %s31_s13, [#allocation3], %s930_s4, %s930_s4, %s931_s18  }
  0x25   :  { %s932_s25 = smov [#allocation7]   ;;  %s933_s27 = smov [#allocation8]  }
  0x26   :  { %s58_s26 = sshll.u32 %s932_s25, 4  ;;  %s72_s28 = sshll.u32 %s933_s27, 4  ;;  %s59_s26 = int_to_ptr.vmem [resolvable:$true] %s58_s26  ;;  %s1025_s28 = int_to_ptr.vmem [resolvable:$true] %s72_s28 }
  0x27   :  { %s852_s12 = scalar_lea.hbm %s1135_s6, 2048 }
  0x28   :  { %p853_p2 = scmp.ne.s32.totalorder %s1135_s6, %s852_s12  ;;  %p856_p3 = scmp.lt.u32.totalorder %s852_s12, %s1135_s6 }
  0x2a   :  { %p858_p4 = pnand %p856_p3, %p853_p2 }
  0x2c   :  { %861 = shalt.err (!%p858_p4)
}
  0x2d   :  { %s862_s2 = scalar_lea.vmem %s59_s26, 2048  ;;  %p867_p6 = scmp.lt.s32.totalorder %s59_s26, %s59_s26 }
  0x2e   :  { %p863_p5 = scmp.ne.s32.totalorder %s59_s26, %s862_s2  ;;  %p868_p7 = scmp.lt.s32.totalorder %s862_s2, %s862_s2 }
  0x30   :  { %p869_p8 = por %p868_p7, %p867_p6 }
  0x32   :  { %p870_p9 = pnand %p869_p8, %p863_p5 }
  0x34   :  { %873 = shalt.err (!%p870_p9)
}
  0x35   :  { %64 = dma.hbm_to_vmem [thread:$0]  %s1135_s6, 2048, %s59_s26, [#allocation6], %s930_s4, %s930_s4, %s931_s18  }
  0x36   :  { %s874_s22 = scalar_lea.hbm %s1137_s8, 2048 }
  0x37   :  { %p875_p10 = scmp.ne.s32.totalorder %s1137_s8, %s874_s22  ;;  %p878_p11 = scmp.lt.u32.totalorder %s874_s22, %s1137_s8 }
  0x39   :  { %p880_p12 = pnand %p878_p11, %p875_p10 }
  0x3b   :  { %883 = shalt.err (!%p880_p12)
}
  0x3c   :  { %s884_s29 = scalar_lea.vmem %s1025_s28, 2048  ;;  %p889_p0 = scmp.lt.s32.totalorder %s1025_s28, %s1025_s28 }
  0x3d   :  { %p885_p13 = scmp.ne.s32.totalorder %s1025_s28, %s884_s29  ;;  %p890_p1 = scmp.lt.s32.totalorder %s884_s29, %s884_s29 }
  0x3f   :  { %p891_p2 = por %p890_p1, %p889_p0 }
  0x41   :  { %p892_p3 = pnand %p891_p2, %p885_p13 }
  0x43   :  { %895 = shalt.err (!%p892_p3)
}
  0x44   :  { %78 = dma.hbm_to_vmem [thread:$0]  %s1137_s8, 2048, %s1025_s28, [#allocation9], %s930_s4, %s930_s4, %s931_s18  }
  0x45   :  { %918 = dma.done.wait [#allocation3], 2048  }
  0x46   :  { %919 = vsyncadd [#allocation3], 4294965248 }
  0x47   :  { %920 = dma.done.wait [#allocation6], 6144  }
  0x48   :  { %921 = vsyncadd [#allocation6], 4294961152 }
  0x49   :  { %922 = dma.done.wait [#allocation9], 2048  }
  0x4a   :  { %923 = vsyncadd [#allocation9], 4294965248  ;;  %v934_v0 = vmov 0.0|0.0   ;;  %vm935_vm0 = vmmov 0   ;;  %v936_v1 = vmov 0.0   ;;  %v94_v2 = vld [vmem:[#allocation2] sm:$0xff] }
  0x4b   :  { %686 = vmatprep.subr.bf16.mxu0 %v934_v0  ;;  %613 = vmatprep.mubr.msk.f32.mxu0 %vm935_vm0, %v936_v1  ;;  %v95_v3 = vld [vmem:[#allocation2 + $0x8] sm:$0xff]  ;;  %v96_v4 = vld [vmem:[#allocation2 + $0x10] sm:$0xff]  ;;  %v97_v6 = vld [vmem:[#allocation2 + $0x18] sm:$0xff] }
  0x4c   :  { %296 = vmatprep.mubr.f32.mxu1 %v936_v1  ;;  %v687_v5 = vpack.c.bf16 %v95_v3, %v94_v2  ;;  %v690_v7 = vpack.c.bf16 %v97_v6, %v96_v4  ;;  %v98_v8 = vld [vmem:[#allocation2 + $0x20] sm:$0xff]  ;;  %v99_v9 = vld [vmem:[#allocation2 + $0x28] sm:$0xff]  ;;  %v100_v11 = vld [vmem:[#allocation2 + $0x30] sm:$0xff] }
  0x4d   :  { %v189_v10 = vld [vmem:[#allocation5 + $0x8] sm:$0xff]  ;;  %v101_v12 = vld [vmem:[#allocation2 + $0x38] sm:$0xff]  ;;  %v188_v14 = vld [vmem:[#allocation5] sm:$0xff]  ;;  %v693_v16 = vpack.c.bf16 %v99_v9, %v98_v8 }
  0x4e   :  { %688 = vmatpush3.bf16.msra.mxu0 %v687_v5  ;;  %v191_v13 = vld [vmem:[#allocation5 + $0x18] sm:$0xff]  ;;  %v190_v15 = vld [vmem:[#allocation5 + $0x10] sm:$0xff]  ;;  %v193_v19 = vld [vmem:[#allocation5 + $0x28] sm:$0xff]  ;;  %v696_v27 = vpack.c.bf16 %v101_v12, %v100_v11 }
  0x4f   :  { %689 = vmatprep.subr.bf16.mxu0 %v934_v0  ;;  %v710_v17 = vpack.c.bf16 %v191_v13, %v189_v10  ;;  %v712_v18 = vpack.c.bf16 %v190_v15, %v188_v14  ;;  %v195_v20 = vld [vmem:[#allocation5 + $0x38] sm:$0xff]  ;;  %v192_v21 = vld [vmem:[#allocation5 + $0x20] sm:$0xff]  ;;  %v194_v23 = vld [vmem:[#allocation5 + $0x30] sm:$0xff] }
  0x50   :  { %v714_v22 = vpack.c.bf16 %v195_v20, %v193_v19  ;;  %v197_v24 = vld [vmem:[#allocation5 + $0x48] sm:$0xff]  ;;  %v199_v25 = vld [vmem:[#allocation5 + $0x58] sm:$0xff]  ;;  %v716_v26 = vpack.c.bf16 %v194_v23, %v192_v21  ;;  %v102_v28 = vld [vmem:[#allocation2 + $0x40] sm:$0xff] }
  0x51   :  { %711 = vmatprep.subr.bf16.mxu1 %v710_v17  ;;  %v718_v29 = vpack.c.bf16 %v199_v25, %v197_v24  ;;  %v196_v30 = vld [vmem:[#allocation5 + $0x40] sm:$0xff]  ;;  %v198_v31 = vld [vmem:[#allocation5 + $0x50] sm:$0xff]  ;;  %v103_v32 = vld [vmem:[#allocation2 + $0x48] sm:$0xff] }
  0x52   :  { %691 = vmatpush3.bf16.msra.mxu0 %v690_v7  ;;  %713 = vmatpush1.bf16.msra.mxu1 %v712_v18  ;;  %v201_v33 = vld [vmem:[#allocation5 + $0x68] sm:$0xff]  ;;  %v203_v34 = vld [vmem:[#allocation5 + $0x78] sm:$0xff]  ;;  %v720_v35 = vpack.c.bf16 %v198_v31, %v196_v30  ;;  %v699_v36 = vpack.c.bf16 %v103_v32, %v102_v28  ;;  %v104_v37 = vld [vmem:[#allocation2 + $0x50] sm:$0xff] }
  0x53   :  { %692 = vmatprep.subr.bf16.mxu0 %v934_v0  ;;  %715 = vmatprep.subr.bf16.mxu1 %v714_v22  ;;  %v722_v38 = vpack.c.bf16 %v203_v34, %v201_v33  ;;  %v200_v39 = vld [vmem:[#allocation5 + $0x60] sm:$0xff]  ;;  %v202_v40 = vld [vmem:[#allocation5 + $0x70] sm:$0xff]  ;;  %v105_v41 = vld [vmem:[#allocation2 + $0x58] sm:$0xff] }
  0x54   :  { %v205_v42 = vld [vmem:[#allocation5 + $0x88] sm:$0xff]  ;;  %v207_v43 = vld [vmem:[#allocation5 + $0x98] sm:$0xff]  ;;  %v724_v44 = vpack.c.bf16 %v202_v40, %v200_v39  ;;  %v702_v45 = vpack.c.bf16 %v105_v41, %v104_v37  ;;  %v106_v46 = vld [vmem:[#allocation2 + $0x60] sm:$0xff] }
  0x55   :  { %v726_v47 = vpack.c.bf16 %v207_v43, %v205_v42  ;;  %v204_v48 = vld [vmem:[#allocation5 + $0x80] sm:$0xff]  ;;  %v206_v49 = vld [vmem:[#allocation5 + $0x90] sm:$0xff]  ;;  %v107_v50 = vld [vmem:[#allocation2 + $0x68] sm:$0xff] }
  0x56   :  { %694 = vmatpush3.bf16.msra.mxu0 %v693_v16  ;;  %717 = vmatpush1.bf16.msra.mxu1 %v716_v26  ;;  %v209_v51 = vld [vmem:[#allocation5 + $0xa8] sm:$0xff]  ;;  %v211_v52 = vld [vmem:[#allocation5 + $0xb8] sm:$0xff]  ;;  %v728_v53 = vpack.c.bf16 %v206_v49, %v204_v48  ;;  %v705_v54 = vpack.c.bf16 %v107_v50, %v106_v46  ;;  %v108_v55 = vld [vmem:[#allocation2 + $0x70] sm:$0xff] }
  0x57   :  { %695 = vmatprep.subr.bf16.mxu0 %v934_v0  ;;  %719 = vmatprep.subr.bf16.mxu1 %v718_v29  ;;  %v730_v56 = vpack.c.bf16 %v211_v52, %v209_v51  ;;  %v208_v57 = vld [vmem:[#allocation5 + $0xa0] sm:$0xff]  ;;  %v210_v58 = vld [vmem:[#allocation5 + $0xb0] sm:$0xff]  ;;  %v109_v59 = vld [vmem:[#allocation2 + $0x78] sm:$0xff] }
  0x58   :  { %v213_v60 = vld [vmem:[#allocation5 + $0xc8] sm:$0xff]  ;;  %v215_v61 = vld [vmem:[#allocation5 + $0xd8] sm:$0xff]  ;;  %v732_v62 = vpack.c.bf16 %v210_v58, %v208_v57  ;;  %v708_v63 = vpack.c.bf16 %v109_v59, %v108_v55  ;;  %v212_v3 = vld [vmem:[#allocation5 + $0xc0] sm:$0xff] }
  0x59   :  { %v734_v2 = vpack.c.bf16 %v215_v61, %v213_v60  ;;  %v214_v4 = vld [vmem:[#allocation5 + $0xd0] sm:$0xff]  ;;  %v93_v6 = vld [vmem:[%s1129_s0] sm:$0xff]  ;;  %v217_v7 = vld [vmem:[#allocation5 + $0xe8] sm:$0xff] }
  0x5a   :  { %697 = vmatpush3.bf16.msra.mxu0 %v696_v27  ;;  %721 = vmatpush1.bf16.msra.mxu1 %v720_v35  ;;  %v736_v5 = vpack.c.bf16 %v214_v4, %v212_v3  ;;  %v219_v8 = vld [vmem:[#allocation5 + $0xf8] sm:$0xff]  ;;  %v216_v10 = vld [vmem:[#allocation5 + $0xe0] sm:$0xff]  ;;  %v218_v11 = vld [vmem:[#allocation5 + $0xf0] sm:$0xff] }
  0x5b   :  { %698 = vmatprep.subr.bf16.mxu0 %v934_v0  ;;  %723 = vmatprep.subr.bf16.mxu1 %v722_v38  ;;  %v738_v9 = vpack.c.bf16 %v219_v8, %v217_v7  ;;  %v740_v12 = vpack.c.bf16 %v218_v11, %v216_v10  ;;  %v309_v13 = vld [vmem:[#allocation7] sm:$0xff]  ;;  %v310_v14 = vld [vmem:[#allocation7 + $0x8] sm:$0xff]  ;;  %v311_v15 = vld [vmem:[#allocation7 + $0x10] sm:$0xff] }
  0x5c   :  { %v743_v16 = vpack.c.bf16 %v310_v14, %v309_v13  ;;  %v312_v17 = vld [vmem:[#allocation7 + $0x18] sm:$0xff]  ;;  %v526_v19 = vld [vmem:[%s1132_s3] ss:$0 sm:$0xff]  ;;  %v314_v25 = vld [vmem:[#allocation7 + $0x28] sm:$0xff] }
  0x5d   :  { %v746_v18 = vpack.c.bf16 %v312_v17, %v311_v15  ;;  %v313_v24 = vld [vmem:[#allocation7 + $0x20] sm:$0xff]  ;;  %v315_v27 = vld [vmem:[#allocation7 + $0x30] sm:$0xff]  ;;  %v316_v28 = vld [vmem:[#allocation7 + $0x38] sm:$0xff] }
  0x5e   :  { %700 = vmatpush3.bf16.msra.mxu0 %v699_v36  ;;  %725 = vmatpush1.bf16.msra.mxu1 %v724_v44  ;;  %v749_v26 = vpack.c.bf16 %v314_v25, %v313_v24  ;;  %v752_v29 = vpack.c.bf16 %v316_v28, %v315_v27  ;;  %v317_v30 = vld [vmem:[#allocation7 + $0x40] sm:$0xff]  ;;  %v318_v31 = vld [vmem:[#allocation7 + $0x48] sm:$0xff]  ;;  %v319_v33 = vld [vmem:[#allocation7 + $0x50] sm:$0xff] }
  0x5f   :  { %701 = vmatprep.subr.bf16.mxu0 %v934_v0  ;;  %727 = vmatprep.subr.bf16.mxu1 %v726_v47  ;;  %v755_v32 = vpack.c.bf16 %v318_v31, %v317_v30  ;;  %v320_v34 = vld [vmem:[#allocation7 + $0x58] sm:$0xff]  ;;  %v321_v35 = vld [vmem:[#allocation7 + $0x60] sm:$0xff]  ;;  %v322_v36 = vld [vmem:[#allocation7 + $0x68] sm:$0xff] }
  0x60   :  { %v761_v37 = vpack.c.bf16 %v322_v36, %v321_v35  ;;  %v323_v38 = vld [vmem:[#allocation7 + $0x70] sm:$0xff]  ;;  %v324_v39 = vld [vmem:[#allocation7 + $0x78] sm:$0xff]  ;;  %v403_v41 = vld [vmem:[#allocation8] sm:$0xff] }
  0x61   :  { %v764_v40 = vpack.c.bf16 %v324_v39, %v323_v38  ;;  %v404_v42 = vld [vmem:[#allocation8 + $0x8] sm:$0xff]  ;;  %v405_v43 = vld [vmem:[#allocation8 + $0x10] sm:$0xff]  ;;  %v407_v47 = vld [vmem:[#allocation8 + $0x20] sm:$0xff] }
  0x62   :  { %703 = vmatpush3.bf16.msra.mxu0 %v702_v45  ;;  %729 = vmatpush1.bf16.msra.mxu1 %v728_v53  ;;  %v767_v44 = vpack.c.bf16 %v404_v42, %v403_v41  ;;  %v406_v45 = vld [vmem:[#allocation8 + $0x18] sm:$0xff]  ;;  %v408_v48 = vld [vmem:[#allocation8 + $0x28] sm:$0xff]  ;;  %v409_v50 = vld [vmem:[#allocation8 + $0x30] sm:$0xff] }
  0x63   :  { %704 = vmatprep.subr.bf16.mxu0 %v934_v0  ;;  %731 = vmatprep.subr.bf16.mxu1 %v730_v56  ;;  %v770_v46 = vpack.c.bf16 %v406_v45, %v405_v43  ;;  %v773_v49 = vpack.c.bf16 %v408_v48, %v407_v47  ;;  %v410_v51 = vld [vmem:[#allocation8 + $0x38] sm:$0xff]  ;;  %v411_v53 = vld [vmem:[#allocation8 + $0x40] sm:$0xff]  ;;  %v413_v56 = vld [vmem:[#allocation8 + $0x50] sm:$0xff] }
  0x64   :  { %v776_v52 = vpack.c.bf16 %v410_v51, %v409_v50  ;;  %v414_v57 = vld [vmem:[#allocation8 + $0x58] sm:$0xff]  ;;  %v415_v59 = vld [vmem:[#allocation8 + $0x60] sm:$0xff]  ;;  %v416_v60 = vld [vmem:[#allocation8 + $0x68] sm:$0xff] }
  0x65   :  { %v782_v58 = vpack.c.bf16 %v414_v57, %v413_v56  ;;  %v785_v61 = vpack.c.bf16 %v416_v60, %v415_v59  ;;  %v220_v3 = vld [vmem:[%s1134_s5] sm:$0x3]  ;;  %v418_v17 = vld [vmem:[#allocation8 + $0x78] sm:$0xff] }
  0x66   :  { %706 = vmatpush3.bf16.msra.mxu0 %v705_v54  ;;  %733 = vmatpush1.bf16.msra.mxu1 %v732_v62  ;;  %v412_v54 = vld [vmem:[#allocation8 + $0x48] sm:$0xff]  ;;  %v222_v62 = vlaneseq  ;;  %v528_v24 = vld [vmem:[%s1138_s9] ss:$0 sm:$0xff] }
  0x67   :  { %707 = vmatprep.subr.bf16.mxu0 %v934_v0  ;;  %735 = vmatprep.subr.bf16.mxu1 %v734_v2  ;;  %v779_v55 = vpack.c.bf16 %v412_v54, %v411_v53 }
  0x6a   :  { %709 = vmatpush3.bf16.msra.mxu0 %v708_v63  ;;  %737 = vmatpush1.bf16.msra.mxu1 %v736_v5  ;;  %v223_v63 = vshrl.u32 %v222_v62, 7 }
  0x6b   :  { %742 = vmatprep.subr.bf16.mxu0 %v934_v0  ;;  %739 = vmatprep.subr.bf16.mxu1 %v738_v9 }
  0x6c   :  { %v224_v2 = vsub.s32 0, %v223_v63  ;;  %v228_v4 = vsub.s32 1, %v223_v63 }
  0x6d   :  { %614 = vmatmul.mubr.f32.vlgmr.msra.gmra.mrb[0].mxu0 %v93_v6 }
  0x6e   :  { %648 = vmatprep.mubr.msk.f32.mxu0 %vm935_vm0, %v936_v1  ;;  %741 = vmatpush1.bf16.msra.mxu1 %v740_v12  ;;  %v225_v5 = vrot.slane %v220_v3, %v224_v2  ;;  %v229_v6 = vrot.slane %v220_v3, %v228_v4  ;;  %v303_v12 = vld [vmem:[%s1130_s1] sm:$0xff]  ;;  %s937_s1 = smov [#allocation10]  }
  0x6f   :  { %766 = vmatprep.subr.bf16.mxu1 %v934_v0  ;;  %744 = vmatpush3.bf16.msra.mxu0 %v743_v16  ;;  %v417_v16 = vld [vmem:[#allocation8 + $0x70] sm:$0xff]  ;;  %s511_s19 = sshll.u32 %s937_s1, 4  ;;  %s512_s19 = int_to_ptr.vmem [resolvable:$true] %s511_s19 }
  0x70   :  { %745 = vmatprep.subr.bf16.mxu0 %v934_v0  ;;  %p901_p5 = scmp.lt.s32.totalorder %s512_s19, %s512_s19 }
  0x73   :  { %747 = vmatpush3.bf16.msra.mxu0 %v746_v18  ;;  %v788_v18 = vpack.c.bf16 %v418_v17, %v417_v16 }
  0x74   :  { %748 = vmatprep.subr.bf16.mxu0 %v934_v0 }
  0x77   :  { %750 = vmatpush3.bf16.msra.mxu0 %v749_v26 }
  0x78   :  { %751 = vmatprep.subr.bf16.mxu0 %v934_v0 }
  0x7b   :  { %753 = vmatpush3.bf16.msra.mxu0 %v752_v29 }
  0x7c   :  { %754 = vmatprep.subr.bf16.mxu0 %v934_v0 }
  0x7f   :  { %756 = vmatpush3.bf16.msra.mxu0 %v755_v32 }
  0x80   :  { %757 = vmatprep.subr.bf16.mxu0 %v934_v0 }
 0x140   :  { %v183_v20 = vpop.f32.mrb[0].mxu0 }
 0x141   :  { %v184_v21 = vadd.f32 %v526_v19, %v183_v20  ;;  %v615_v22 = vpop.f32.mrb[1].mxu0  ;;  %v527_v19 = vld [vmem:[%s1136_s7] ss:$0 sm:$0xff]  ;;  %s896_s7 = scalar_lea.vmem %s512_s19, 128 }
 0x142   :  { %p897_p4 = scmp.ne.s32.totalorder %s512_s19, %s896_s7  ;;  %p902_p6 = scmp.lt.s32.totalorder %s896_s7, %s896_s7 }
 0x143   :  { %v187_v23 = vmax.f32 %v184_v21, 0.0 }
 0x144   :  { %p903_p7 = por %p902_p6, %p901_p5 }
 0x145   :  { %297 = vmatmul.mubr.f32.vlgmr.msra.gmra.mrb[0].mxu1 %v187_v23 }
 0x146   :  { %683 = vmatprep.mubr.msk.f32.mxu1 %vm935_vm0, %v936_v1  ;;  %v758_v1 = vpack.c.bf16 %v320_v34, %v319_v33  ;;  %768 = vmatpush3.bf16.msra.mxu1 %v767_v44  ;;  %p904_p8 = pnand %p903_p7, %p897_p4 }
 0x147   :  { %769 = vmatprep.subr.bf16.mxu1 %v934_v0 }
 0x148   :  { %759 = vmatpush3.bf16.msra.mxu0 %v758_v1 }
 0x149   :  { %760 = vmatprep.subr.bf16.mxu0 %v934_v0 }
 0x14a   :  { %771 = vmatpush3.bf16.msra.mxu1 %v770_v46 }
 0x14b   :  { %772 = vmatprep.subr.bf16.mxu1 %v934_v0 }
 0x14c   :  { %762 = vmatpush3.bf16.msra.mxu0 %v761_v37 }
 0x14d   :  { %763 = vmatprep.subr.bf16.mxu0 %v934_v0 }
 0x14e   :  { %774 = vmatpush3.bf16.msra.mxu1 %v773_v49 }
 0x14f   :  { %775 = vmatprep.subr.bf16.mxu1 %v934_v0 }
 0x150   :  { %765 = vmatpush3.bf16.msra.mxu0 %v764_v40 }
 0x152   :  { %777 = vmatpush3.bf16.msra.mxu1 %v776_v52 }
 0x153   :  { %778 = vmatprep.subr.bf16.mxu1 %v934_v0 }
 0x156   :  { %780 = vmatpush3.bf16.msra.mxu1 %v779_v55 }
 0x157   :  { %781 = vmatprep.subr.bf16.mxu1 %v934_v0 }
 0x15a   :  { %783 = vmatpush3.bf16.msra.mxu1 %v782_v58 }
 0x15b   :  { %784 = vmatprep.subr.bf16.mxu1 %v934_v0 }
 0x15e   :  { %786 = vmatpush3.bf16.msra.mxu1 %v785_v61 }
 0x15f   :  { %787 = vmatprep.subr.bf16.mxu1 %v934_v0 }
 0x162   :  { %789 = vmatpush3.bf16.msra.mxu1 %v788_v18 }
 0x218   :  { %v298_v7 = vpop.f32.mrb[0].mxu1 }
 0x219   :  { %v299_v8 = vadd.f32 %v298_v7, %v225_v5  ;;  %v300_v9 = vpop.f32.mrb[1].mxu1 }
 0x21a   :  { %v301_v10 = vadd.f32 %v300_v9, %v229_v6 }
 0x21b   :  { %503 = vst [vmem:[%s1140_s11] sm:$0xff] %v299_v8 }
 0x21c   :  { %v304_v11 = vmul.f32 0.5, %v301_v10  ;;  %504 = vst [vmem:[%s1140_s11 + $0x8] sm:$0xff] %v301_v10 }
 0x21e   :  { %v305_v0 = vmul.f32 1.442695, %v304_v11 }
 0x220   :  { %802 = vpow2.f32 %v305_v0 }
 0x22a   :  { %v803_v13 = vpop.eup %802 }
 0x22b   :  { %v307_v14 = vmul.f32 %v803_v13, %v303_v12 }
 0x22d   :  { %v308_v15 = vadd.f32 %v307_v14, %v299_v8 }
 0x22f   :  { %649 = vmatmul.mubr.f32.vlgmr.msra.gmra.mrb[2].mxu0 %v308_v15 }
 0x302   :  { %v398_v20 = vpop.f32.mrb[2].mxu0 }
 0x303   :  { %v399_v21 = vadd.f32 %v527_v19, %v398_v20  ;;  %v650_v22 = vpop.f32.mrb[3].mxu0 }
 0x305   :  { %v402_v23 = vmax.f32 %v399_v21, 0.0 }
 0x307   :  { %684 = vmatmul.mubr.f32.vlgmr.msra.gmra.mrb[2].mxu1 %v402_v23 }
 0x3da   :  { %v492_v25 = vpop.f32.mrb[2].mxu1 }
 0x3db   :  { %v493_v26 = vadd.f32 %v528_v24, %v492_v25  ;;  %v685_v27 = vpop.f32.mrb[3].mxu1 }
 0x3dd   :  { %v529_v28 = vmul.f32 -1.442695, %v493_v26 }
 0x3df   :  { %804 = vpow2.f32 %v529_v28 }
 0x3e9   :  { %v805_v29 = vpop.eup %804 }
 0x3ea   :  { %v499_v30 = vadd.f32 1.0, %v805_v29 }
 0x3ec   :  { %806 = vrcp.f32 %v499_v30 }
 0x3f6   :  { %v807_v31 = vpop.eup %806 }
 0x3f7   :  { %502 = vst [vmem:[#allocation10] sm:$0xff] %v807_v31 }
 0x3f8   :  { %907 = shalt.err (!%p904_p8)
}
 0x3f9   :  { %s908_s21 = scalar_lea.hbm %s1139_s10, 128 }
 0x3fa   :  { %p909_p9 = scmp.ne.s32.totalorder %s1139_s10, %s908_s21  ;;  %p912_p10 = scmp.lt.u32.totalorder %s908_s21, %s1139_s10 }
 0x3fc   :  { %p914_p11 = pnand %p912_p10, %p909_p9 }
 0x3fe   :  { %917 = shalt.err (!%p914_p11)
}
 0x3ff   :  { %514 = dma.vmem_to_hbm [thread:$0]  %s512_s19, 128, %s1139_s10, [#allocation4]  }
 0x400   :  { %924 = dma.done.wait [#allocation4], 128  }
 0x401   :  { %925 = vsyncadd [#allocation4], 4294967168 }
 0x402   :  { %522 = vsyncpa [#allocation3], 1 }
 0x403   :  { %523 = vsyncpa [#allocation6], 1 }
 0x404   :  { %524 = vsyncpa [#allocation9], 1 }
 0x405   :  { %525 = vsyncpa [#allocation4], 1 }

</bundles_post_ra>
